<compile_context>
chip_gen: v5e
topology: v5e:2x2
jax: 0.10.0
libtpu: 0.0.40
codegen_flags: <defaults>
</compile_context>

<pallas_src>
import jax
import jax.numpy as jnp
from jax.experimental import pallas as pl
from jax.experimental.pallas import tpu as pltpu

LANE = 128
TB_MAX = 1024   # big tiles amortize per-grid-step overhead; VMEM footprint stays tiny


def _round_up(x, m):
    return ((x + m - 1) // m) * m


def _choose_tb(batch):
    """Adaptive batch tile.

    - tiny B: one step, rounded to 16 rows (bf16 sublane packing)
    - B > 32: aim for >= 2 grid steps so v7x's 2 TensorCores both get work,
      capped at TB_MAX (which also keeps v5e/v6e step counts low for big B).
    """
    if batch <= 32:
        return _round_up(max(batch, 1), 16)
    half = pl.cdiv(batch, 2)
    tb = _round_up(half, 256 if half >= 256 else 16)
    return min(TB_MAX, tb)


# ---------------------------------------------------------------------------
# Kernel
# ---------------------------------------------------------------------------
def actor_kernel(x_ref,
                 w1_ref, b1_ref,
                 w2_ref, b2_ref,
                 w3_ref, b3_ref,
                 wh_ref, bh_ref,
                 lo_ref, hi_ref,
                 out_ref):
    x = x_ref[...].astype(jnp.bfloat16)                                # (TB, SD)

    # fc1 + ReLU   (accumulate in f32, carry activations as bf16)
    h = jnp.dot(x, w1_ref[...], preferred_element_type=jnp.float32) + b1_ref[...]
    h = jnp.maximum(h, 0.0).astype(jnp.bfloat16)
    # fc2 + ReLU
    h = jnp.dot(h, w2_ref[...], preferred_element_type=jnp.float32) + b2_ref[...]
    h = jnp.maximum(h, 0.0).astype(jnp.bfloat16)
    # fc3 + ReLU
    h = jnp.dot(h, w3_ref[...], preferred_element_type=jnp.float32) + b3_ref[...]
    h = jnp.maximum(h, 0.0).astype(jnp.bfloat16)

    # fused heads: columns = [mean | log_std | zero-pad], lane-dense (TB, 128)
    slab = jnp.dot(h, wh_ref[...], preferred_element_type=jnp.float32) + bh_ref[...]

    # per-lane clamp: mean lanes see (-inf, +inf) -> pass-through,
    # log_std lanes see [-20, 2]. Two VPU ops per vreg.
    slab = jnp.minimum(jnp.maximum(slab, lo_ref[...]), hi_ref[...])

    out_ref[...] = slab.astype(out_ref.dtype)


# ---------------------------------------------------------------------------
# Param prep (one-time): fuse heads, pad head width to 128 lanes, cast to bf16
# ---------------------------------------------------------------------------
def prepare_actor_params(params, state_dim, action_dim):
    hidden = params["w1"].shape[1]
    out_w = _round_up(2 * action_dim, LANE)

    wh = jnp.concatenate([params["wm"], params["ws"]], axis=1)
    wh = jnp.pad(wh, ((0, 0), (0, out_w - 2 * action_dim)))
    bh = jnp.concatenate([params["bm"], params["bs"]], axis=1)
    bh = jnp.pad(bh, ((0, 0), (0, out_w - 2 * action_dim)))

    # per-lane clamp bounds over the fused output slab
    lo = jnp.full((1, out_w), -jnp.inf, jnp.float32)
    hi = jnp.full((1, out_w), jnp.inf, jnp.float32)
    lo = lo.at[:, action_dim:2 * action_dim].set(-20.0)
    hi = hi.at[:, action_dim:2 * action_dim].set(2.0)

    prep = dict(
        w1=params["w1"].astype(jnp.bfloat16), b1=params["b1"].astype(jnp.float32),
        w2=params["w2"].astype(jnp.bfloat16), b2=params["b2"].astype(jnp.float32),
        w3=params["w3"].astype(jnp.bfloat16), b3=params["b3"].astype(jnp.float32),
        wh=wh.astype(jnp.bfloat16), bh=bh.astype(jnp.float32),
        lo=lo, hi=hi,
    )
    meta = dict(state_dim=state_dim, action_dim=action_dim,
                hidden=hidden, out_w=out_w)
    return prep, meta


# ---------------------------------------------------------------------------
# Forward wrapper
# ---------------------------------------------------------------------------
def actor_forward(state, prep, meta):
    """state: (B, state_dim) f32.  Returns (mean, log_std), each (B, action_dim) f32."""
    B, SD = state.shape
    A = meta["action_dim"]
    H = meta["hidden"]
    W = meta["out_w"]

    TB = _choose_tb(B)
    grid = (pl.cdiv(B, TB),)   # ragged last block handled by Pallas (rows independent)

    slab = pl.pallas_call(
        actor_kernel,
        out_shape=jax.ShapeDtypeStruct((B, W), jnp.float32),
        grid=grid,
        in_specs=[
            pl.BlockSpec((TB, SD), lambda i: (i, 0)),       # x: tiled over batch, f32
            pl.BlockSpec((SD, H), lambda i: (0, 0)),        # weights: VMEM-resident
            pl.BlockSpec((1, H), lambda i: (0, 0)),
            pl.BlockSpec((H, H), lambda i: (0, 0)),
            pl.BlockSpec((1, H), lambda i: (0, 0)),
            pl.BlockSpec((H, H), lambda i: (0, 0)),
            pl.BlockSpec((1, H), lambda i: (0, 0)),
            pl.BlockSpec((H, W), lambda i: (0, 0)),         # fused heads
            pl.BlockSpec((1, W), lambda i: (0, 0)),
            pl.BlockSpec((1, W), lambda i: (0, 0)),         # lo clamp bounds
            pl.BlockSpec((1, W), lambda i: (0, 0)),         # hi clamp bounds
        ],
        out_specs=pl.BlockSpec((TB, W), lambda i: (i, 0)),  # lane-dense (TB, 128) slab
        compiler_params=pltpu.CompilerParams(
            dimension_semantics=("parallel",),              # v7x: split batch over 2 TCs
        ),
    )(state, prep["w1"], prep["b1"], prep["w2"], prep["b2"],
      prep["w3"], prep["b3"], prep["wh"], prep["bh"], prep["lo"], prep["hi"])

    mean = slab[:, :A]
    log_std = slab[:, A:2 * A]
    return mean, log_std


# ---------------------------------------------------------------------------
# Init (matches nn.Linear default: U(-1/sqrt(fan_in), 1/sqrt(fan_in)))
# ---------------------------------------------------------------------------
def init_actor_params(key, state_dim, action_dim, hidden_dim=256):
    def linear(k, fan_in, fan_out):
        kw, kb = jax.random.split(k)
        bound = 1.0 / jnp.sqrt(fan_in)
        w = jax.random.uniform(kw, (fan_in, fan_out), jnp.float32, -bound, bound)
        b = jax.random.uniform(kb, (1, fan_out), jnp.float32, -bound, bound)
        return w, b

    k1, k2, k3, k4, k5 = jax.random.split(key, 5)
    w1, b1 = linear(k1, state_dim, hidden_dim)
    w2, b2 = linear(k2, hidden_dim, hidden_dim)
    w3, b3 = linear(k3, hidden_dim, hidden_dim)
    wm, bm = linear(k4, hidden_dim, action_dim)
    ws, bs = linear(k5, hidden_dim, action_dim)
    return dict(w1=w1, b1=b1, w2=w2, b2=b2, w3=w3, b3=b3,
                wm=wm, bm=bm, ws=ws, bs=bs)


# ---------------------------------------------------------------------------
# Pure-JAX reference (replicates the kernel's bf16 weight/activation rounding)
# ---------------------------------------------------------------------------
def actor_reference(state, params):
    def bf(v):
        return v.astype(jnp.bfloat16)

    h = jnp.dot(bf(state), bf(params["w1"]), preferred_element_type=jnp.float32) + params["b1"]
    h = bf(jnp.maximum(h, 0.0))
    h = jnp.dot(h, bf(params["w2"]), preferred_element_type=jnp.float32) + params["b2"]
    h = bf(jnp.maximum(h, 0.0))
    h = jnp.dot(h, bf(params["w3"]), preferred_element_type=jnp.float32) + params["b3"]
    h = bf(jnp.maximum(h, 0.0))
    mean = jnp.dot(h, bf(params["wm"]), preferred_element_type=jnp.float32) + params["bm"]
    log_std = jnp.dot(h, bf(params["ws"]), preferred_element_type=jnp.float32) + params["bs"]
    log_std = jnp.clip(log_std, -20.0, 2.0)
    return mean, log_std


if __name__ == "__main__":
    B, STATE_DIM, ACTION_DIM, HIDDEN_DIM = 2, 16, 4, 256

    key = jax.random.PRNGKey(0)
    kp, kx, kx2 = jax.random.split(key, 3)
    params = init_actor_params(kp, STATE_DIM, ACTION_DIM, HIDDEN_DIM)
    prep, meta = prepare_actor_params(params, STATE_DIM, ACTION_DIM)

    # --- small-batch path (single grid step, ragged 2-row block) ---
    state = jax.random.normal(kx, (B, STATE_DIM), jnp.float32)
    mean, log_std = actor_forward(state, prep, meta)
    jax.block_until_ready((mean, log_std))

    mean_ref, log_std_ref = actor_reference(state, params)
    assert mean.shape == (B, ACTION_DIM) and log_std.shape == (B, ACTION_DIM)
    assert jnp.allclose(mean, mean_ref, atol=1e-2, rtol=1e-2)
    assert jnp.allclose(log_std, log_std_ref, atol=1e-2, rtol=1e-2)
    assert bool(jnp.all(log_std <= 2.0)) and bool(jnp.all(log_std >= -20.0))

    # --- multi-step path (B=300 -> 2 grid steps, exercises ragged last block) ---
    B2 = 300
    state2 = jax.random.normal(kx2, (B2, STATE_DIM), jnp.float32)
    mean2, log_std2 = actor_forward(state2, prep, meta)
    jax.block_until_ready((mean2, log_std2))
    mean2_ref, log_std2_ref = actor_reference(state2, params)
    assert mean2.shape == (B2, ACTION_DIM) and log_std2.shape == (B2, ACTION_DIM)
    assert jnp.allclose(mean2, mean2_ref, atol=1e-2, rtol=1e-2)
    assert jnp.allclose(log_std2, log_std2_ref, atol=1e-2, rtol=1e-2)

    print("KERNEL_OK")
</pallas_src>

<mosaic_0001>
module attributes {stable_mosaic.version = 11 : i64} {
  func.func @actor_kernel(%arg0: i32, %arg1: memref<16x16xf32, #tpu.memory_space<vmem>>, %arg2: memref<16x256xbf16, #tpu.memory_space<vmem>>, %arg3: memref<1x256xf32, #tpu.memory_space<vmem>>, %arg4: memref<256x256xbf16, #tpu.memory_space<vmem>>, %arg5: memref<1x256xf32, #tpu.memory_space<vmem>>, %arg6: memref<256x256xbf16, #tpu.memory_space<vmem>>, %arg7: memref<1x256xf32, #tpu.memory_space<vmem>>, %arg8: memref<256x128xbf16, #tpu.memory_space<vmem>>, %arg9: memref<1x128xf32, #tpu.memory_space<vmem>>, %arg10: memref<1x128xf32, #tpu.memory_space<vmem>>, %arg11: memref<1x128xf32, #tpu.memory_space<vmem>>, %arg12: memref<16x128xf32, #tpu.memory_space<vmem>>) attributes {dimension_semantics = [#tpu.dimension_semantics<parallel>], iteration_bounds = array<i64: 1>, scalar_prefetch = 0 : i64, scratch_operands = 0 : i64, tpu.core_type = #tpu.core_type<tc>, window_params = [{transform_indices = @transform_0, window_bounds = array<i64: 16, 16>}, {pipeline_mode = #tpu.pipeline_mode<synchronous>, transform_indices = @transform_1, window_bounds = array<i64: 16, 256>}, {pipeline_mode = #tpu.pipeline_mode<synchronous>, transform_indices = @transform_2, window_bounds = array<i64: 1, 256>}, {pipeline_mode = #tpu.pipeline_mode<synchronous>, transform_indices = @transform_3, window_bounds = array<i64: 256, 256>}, {pipeline_mode = #tpu.pipeline_mode<synchronous>, transform_indices = @transform_4, window_bounds = array<i64: 1, 256>}, {pipeline_mode = #tpu.pipeline_mode<synchronous>, transform_indices = @transform_5, window_bounds = array<i64: 256, 256>}, {pipeline_mode = #tpu.pipeline_mode<synchronous>, transform_indices = @transform_6, window_bounds = array<i64: 1, 256>}, {pipeline_mode = #tpu.pipeline_mode<synchronous>, transform_indices = @transform_7, window_bounds = array<i64: 256, 128>}, {pipeline_mode = #tpu.pipeline_mode<synchronous>, transform_indices = @transform_8, window_bounds = array<i64: 1, 128>}, {pipeline_mode = #tpu.pipeline_mode<synchronous>, transform_indices = @transform_9, window_bounds = array<i64: 1, 128>}, {pipeline_mode = #tpu.pipeline_mode<synchronous>, transform_indices = @transform_10, window_bounds = array<i64: 1, 128>}, {transform_indices = @transform_11, window_bounds = array<i64: 16, 128>}]} {
    %c0 = arith.constant 0 : index
    %c0_0 = arith.constant 0 : index
    %0 = vector.load %arg1[%c0, %c0_0] : memref<16x16xf32, #tpu.memory_space<vmem>>, vector<16x16xf32>
    %1 = arith.truncf %0 : vector<16x16xf32> to vector<16x16xbf16>
    %c0_1 = arith.constant 0 : index
    %c0_2 = arith.constant 0 : index
    %2 = vector.load %arg2[%c0_1, %c0_2] : memref<16x256xbf16, #tpu.memory_space<vmem>>, vector<16x256xbf16>
    %cst = arith.constant dense<0.000000e+00> : vector<16x256xf32>
    %3 = tpu.matmul %1, %2, %cst {dimension_numbers = #tpu.dot_dimension_numbers<[1], [0], [0], [1], [0, 0, 1, 1], [], []>} : vector<16x16xbf16>, vector<16x256xbf16>, vector<16x256xf32> -> vector<16x256xf32>
    %c0_3 = arith.constant 0 : index
    %c0_4 = arith.constant 0 : index
    %4 = vector.load %arg3[%c0_3, %c0_4] : memref<1x256xf32, #tpu.memory_space<vmem>>, vector<1x256xf32>
    %5 = vector.broadcast %4 : vector<1x256xf32> to vector<16x256xf32>
    %6 = arith.addf %3, %5 : vector<16x256xf32>
    %cst_5 = arith.constant 0.000000e+00 : f32
    %7 = vector.broadcast %cst_5 : f32 to vector<16x256xf32>
    %8 = arith.maximumf %6, %7 : vector<16x256xf32>
    %9 = arith.truncf %8 : vector<16x256xf32> to vector<16x256xbf16>
    %c0_6 = arith.constant 0 : index
    %c0_7 = arith.constant 0 : index
    %10 = vector.load %arg4[%c0_6, %c0_7] : memref<256x256xbf16, #tpu.memory_space<vmem>>, vector<256x256xbf16>
    %cst_8 = arith.constant dense<0.000000e+00> : vector<16x256xf32>
    %11 = tpu.matmul %9, %10, %cst_8 {dimension_numbers = #tpu.dot_dimension_numbers<[1], [0], [0], [1], [0, 0, 1, 1], [], []>} : vector<16x256xbf16>, vector<256x256xbf16>, vector<16x256xf32> -> vector<16x256xf32>
    %c0_9 = arith.constant 0 : index
    %c0_10 = arith.constant 0 : index
    %12 = vector.load %arg5[%c0_9, %c0_10] : memref<1x256xf32, #tpu.memory_space<vmem>>, vector<1x256xf32>
    %13 = vector.broadcast %12 : vector<1x256xf32> to vector<16x256xf32>
    %14 = arith.addf %11, %13 : vector<16x256xf32>
    %cst_11 = arith.constant 0.000000e+00 : f32
    %15 = vector.broadcast %cst_11 : f32 to vector<16x256xf32>
    %16 = arith.maximumf %14, %15 : vector<16x256xf32>
    %17 = arith.truncf %16 : vector<16x256xf32> to vector<16x256xbf16>
    %c0_12 = arith.constant 0 : index
    %c0_13 = arith.constant 0 : index
    %18 = vector.load %arg6[%c0_12, %c0_13] : memref<256x256xbf16, #tpu.memory_space<vmem>>, vector<256x256xbf16>
    %cst_14 = arith.constant dense<0.000000e+00> : vector<16x256xf32>
    %19 = tpu.matmul %17, %18, %cst_14 {dimension_numbers = #tpu.dot_dimension_numbers<[1], [0], [0], [1], [0, 0, 1, 1], [], []>} : vector<16x256xbf16>, vector<256x256xbf16>, vector<16x256xf32> -> vector<16x256xf32>
    %c0_15 = arith.constant 0 : index
    %c0_16 = arith.constant 0 : index
    %20 = vector.load %arg7[%c0_15, %c0_16] : memref<1x256xf32, #tpu.memory_space<vmem>>, vector<1x256xf32>
    %21 = vector.broadcast %20 : vector<1x256xf32> to vector<16x256xf32>
    %22 = arith.addf %19, %21 : vector<16x256xf32>
    %cst_17 = arith.constant 0.000000e+00 : f32
    %23 = vector.broadcast %cst_17 : f32 to vector<16x256xf32>
    %24 = arith.maximumf %22, %23 : vector<16x256xf32>
    %25 = arith.truncf %24 : vector<16x256xf32> to vector<16x256xbf16>
    %c0_18 = arith.constant 0 : index
    %c0_19 = arith.constant 0 : index
    %26 = vector.load %arg8[%c0_18, %c0_19] : memref<256x128xbf16, #tpu.memory_space<vmem>>, vector<256x128xbf16>
    %cst_20 = arith.constant dense<0.000000e+00> : vector<16x128xf32>
    %27 = tpu.matmul %25, %26, %cst_20 {dimension_numbers = #tpu.dot_dimension_numbers<[1], [0], [0], [1], [0, 0, 1, 1], [], []>} : vector<16x256xbf16>, vector<256x128xbf16>, vector<16x128xf32> -> vector<16x128xf32>
    %c0_21 = arith.constant 0 : index
    %c0_22 = arith.constant 0 : index
    %28 = vector.load %arg9[%c0_21, %c0_22] : memref<1x128xf32, #tpu.memory_space<vmem>>, vector<1x128xf32>
    %29 = vector.broadcast %28 : vector<1x128xf32> to vector<16x128xf32>
    %30 = arith.addf %27, %29 : vector<16x128xf32>
    %c0_23 = arith.constant 0 : index
    %c0_24 = arith.constant 0 : index
    %31 = vector.load %arg10[%c0_23, %c0_24] : memref<1x128xf32, #tpu.memory_space<vmem>>, vector<1x128xf32>
    %32 = vector.broadcast %31 : vector<1x128xf32> to vector<16x128xf32>
    %33 = arith.maximumf %30, %32 : vector<16x128xf32>
    %c0_25 = arith.constant 0 : index
    %c0_26 = arith.constant 0 : index
    %34 = vector.load %arg11[%c0_25, %c0_26] : memref<1x128xf32, #tpu.memory_space<vmem>>, vector<1x128xf32>
    %35 = vector.broadcast %34 : vector<1x128xf32> to vector<16x128xf32>
    %36 = arith.minimumf %33, %35 : vector<16x128xf32>
    %c0_27 = arith.constant 0 : index
    %c0_28 = arith.constant 0 : index
    %37 = vector.load %arg12[%c0_27, %c0_28] : memref<16x128xf32, #tpu.memory_space<vmem>>, vector<16x128xf32>
    tpu.vector_store %arg12[%c0_27, %c0_28], %36 {strides = array<i32>} : memref<16x128xf32, #tpu.memory_space<vmem>>, vector<16x128xf32>,
    return
  }
  func.func @transform_0(%arg0: i32) -> (i32, i32) {
    %c0_i32 = arith.constant 0 : i32
    %c0_i32_0 = arith.constant 0 : i32
    return %arg0, %c0_i32 : i32, i32
  }
  func.func @transform_1(%arg0: i32) -> (i32, i32) {
    %c0_i32 = arith.constant 0 : i32
    %c0_i32_0 = arith.constant 0 : i32
    %c0_i32_1 = arith.constant 0 : i32
    return %c0_i32, %c0_i32_0 : i32, i32
  }
  func.func @transform_2(%arg0: i32) -> (i32, i32) {
    %c0_i32 = arith.constant 0 : i32
    %c0_i32_0 = arith.constant 0 : i32
    %c0_i32_1 = arith.constant 0 : i32
    return %c0_i32, %c0_i32_0 : i32, i32
  }
  func.func @transform_3(%arg0: i32) -> (i32, i32) {
    %c0_i32 = arith.constant 0 : i32
    %c0_i32_0 = arith.constant 0 : i32
    %c0_i32_1 = arith.constant 0 : i32
    return %c0_i32, %c0_i32_0 : i32, i32
  }
  func.func @transform_4(%arg0: i32) -> (i32, i32) {
    %c0_i32 = arith.constant 0 : i32
    %c0_i32_0 = arith.constant 0 : i32
    %c0_i32_1 = arith.constant 0 : i32
    return %c0_i32, %c0_i32_0 : i32, i32
  }
  func.func @transform_5(%arg0: i32) -> (i32, i32) {
    %c0_i32 = arith.constant 0 : i32
    %c0_i32_0 = arith.constant 0 : i32
    %c0_i32_1 = arith.constant 0 : i32
    return %c0_i32, %c0_i32_0 : i32, i32
  }
  func.func @transform_6(%arg0: i32) -> (i32, i32) {
    %c0_i32 = arith.constant 0 : i32
    %c0_i32_0 = arith.constant 0 : i32
    %c0_i32_1 = arith.constant 0 : i32
    return %c0_i32, %c0_i32_0 : i32, i32
  }
  func.func @transform_7(%arg0: i32) -> (i32, i32) {
    %c0_i32 = arith.constant 0 : i32
    %c0_i32_0 = arith.constant 0 : i32
    %c0_i32_1 = arith.constant 0 : i32
    return %c0_i32, %c0_i32_0 : i32, i32
  }
  func.func @transform_8(%arg0: i32) -> (i32, i32) {
    %c0_i32 = arith.constant 0 : i32
    %c0_i32_0 = arith.constant 0 : i32
    %c0_i32_1 = arith.constant 0 : i32
    return %c0_i32, %c0_i32_0 : i32, i32
  }
  func.func @transform_9(%arg0: i32) -> (i32, i32) {
    %c0_i32 = arith.constant 0 : i32
    %c0_i32_0 = arith.constant 0 : i32
    %c0_i32_1 = arith.constant 0 : i32
    return %c0_i32, %c0_i32_0 : i32, i32
  }
  func.func @transform_10(%arg0: i32) -> (i32, i32) {
    %c0_i32 = arith.constant 0 : i32
    %c0_i32_0 = arith.constant 0 : i32
    %c0_i32_1 = arith.constant 0 : i32
    return %c0_i32, %c0_i32_0 : i32, i32
  }
  func.func @transform_11(%arg0: i32) -> (i32, i32) {
    %c0_i32 = arith.constant 0 : i32
    %c0_i32_0 = arith.constant 0 : i32
    return %arg0, %c0_i32 : i32, i32
  }
}

</mosaic_0001>

<bundles_post_ra>
// kernel: tpu_custom_call.1
= control target key start
LH: loop header
LB: loop body
LE: loop exit
PB: predicated region body
PF: predicated region fallthrough
CT: control target
= control target key end

     0   :  { %16 = vsyncpa [#allocation3], 0  ;;  %s1639_s0 = inlined_call_operand.hbm [shape: f32[2,16], index: 0, kind: input, shape index: {}]   ;;  %s1640_s1 = inlined_call_operand.hbm [shape: bf16[16,256], index: 1, kind: input, shape index: {}]   ;;  %s1641_s2 = inlined_call_operand.hbm [shape: f32[1,256], index: 2, kind: input, shape index: {}]   ;;  %s1642_s3 = inlined_call_operand.hbm [shape: bf16[256,256], index: 3, kind: input, shape index: {}]   ;;  %s1643_s4 = inlined_call_operand.vmem [shape: f32[1,256], index: 4, kind: input, shape index: {}]   ;;  %s1644_s5 = inlined_call_operand.hbm [shape: bf16[256,256], index: 5, kind: input, shape index: {}]   ;;  %s1645_s6 = inlined_call_operand.vmem [shape: f32[1,256], index: 6, kind: input, shape index: {}]   ;;  %s1646_s7 = inlined_call_operand.hbm [shape: bf16[256,128], index: 7, kind: input, shape index: {}]   ;;  %s1647_s8 = inlined_call_operand.vmem [shape: f32[1,128], index: 8, kind: input, shape index: {}]   ;;  %s1648_s9 = inlined_call_operand.vmem [shape: f32[1,128], index: 9, kind: input, shape index: {}]   ;;  %s1649_s10 = inlined_call_operand.vmem [shape: f32[1,128], index: 10, kind: input, shape index: {}]   ;;  %s1650_s11 = inlined_call_operand.hbm [shape: f32[2,128], index: 11, kind: output, shape index: {}]  }
   0x1   :  { %17 = vsyncpa [#allocation6], 0 }
   0x2   :  { %18 = vsyncpa [#allocation9], 0 }
   0x3   :  { %19 = vsyncpa [#allocation12], 0 }
   0x4   :  { %20 = vsyncpa [#allocation4], 0  ;;  %s38_s19 = sshll.u32 %s1640_s1, 4  ;;  %s39_s19 = int_to_ptr.hbm [resolvable:$true] %s38_s19 }
   0x5   :  { %24 = vsyncadd [#allocation3], 224  ;;  %s1513_s20 = smov [#allocation5]   ;;  %s62_s24 = sshll.u32 %s1642_s3, 4  ;;  %s63_s24 = int_to_ptr.hbm [resolvable:$true] %s62_s24 }
   0x6   :  { %s40_s21 = sshll.u32 %s1513_s20, 4  ;;  %s1514_s25 = smov 128   ;;  %s41_s21 = int_to_ptr.vmem [resolvable:$true] %s40_s21 }
   0x7   :  { %s1515_s26 = smov 8   ;;  %s1516_s27 = smov [#allocation8]  }
   0x8   :  { %46 = dma.hbm_to_vmem [thread:$0]  %s39_s19, 256, %s41_s21, [#allocation6], %s1514_s25, %s1514_s25, %s1515_s26  }
   0x9   :  { %s64_s28 = sshll.u32 %s1516_s27, 4  ;;  %s25_s30 = sshll.u32 %s1639_s0, 4  ;;  %s65_s28 = int_to_ptr.vmem [resolvable:$true] %s64_s28  ;;  %s26_s30 = int_to_ptr.hbm [resolvable:$true] %s25_s30 }
   0xa   :  { %70 = dma.hbm_to_vmem [thread:$0]  %s63_s24, 4096, %s65_s28, [#allocation9], %s1514_s25, %s1514_s25, %s1515_s26  }
   0xb   :  { %s1517_s3 = smov [#allocation2]   ;;  %s52_s15 = sshll.u32 %s1641_s2, 4  ;;  %s53_s15 = int_to_ptr.hbm [resolvable:$true] %s52_s15 }
   0xc   :  { %s27_s12 = sshll.u32 %s1517_s3, 4  ;;  %s1518_s16 = smov 32   ;;  %s28_s12 = int_to_ptr.vmem [resolvable:$true] %s27_s12 }
   0xd   :  { %s1519_s17 = smov 2   ;;  %s1520_s0 = smov [#allocation7]  }
   0xe   :  { %33 = dma.hbm_to_vmem [thread:$0]  %s26_s30, 32, %s28_s12, [#allocation3], %s1518_s16, %s1518_s16, %s1519_s17  }
   0xf   :  { %s54_s18 = sshll.u32 %s1520_s0, 4  ;;  %s77_s21 = sshll.u32 %s1644_s5, 4  ;;  %s55_s18 = int_to_ptr.vmem [resolvable:$true] %s54_s18  ;;  %s78_s21 = int_to_ptr.hbm [resolvable:$true] %s77_s21 }
  0x10   :  { %57 = dma.hbm_to_vmem [thread:$0]  %s53_s15, 32, %s55_s18, [#allocation6]  }
  0x11   :  { %s92_s2 = sshll.u32 %s1646_s7, 4  ;;  %s1521_s24 = smov [#allocation10]   ;;  %s93_s2 = int_to_ptr.hbm [resolvable:$true] %s92_s2 }
  0x12   :  { %s79_s27 = sshll.u32 %s1521_s24, 4  ;;  %s1522_s28 = smov [#allocation11]   ;;  %s80_s27 = int_to_ptr.vmem [resolvable:$true] %s79_s27 }
  0x13   :  { %85 = dma.hbm_to_vmem [thread:$0]  %s78_s21, 4096, %s80_s27, [#allocation9], %s1514_s25, %s1514_s25, %s1515_s26  }
  0x14   :  { %s94_s29 = sshll.u32 %s1522_s28, 4  ;;  %s1523_s1 = smov 64   ;;  %s95_s29 = int_to_ptr.vmem [resolvable:$true] %s94_s29 }
  0x15   :  { %s1524_s5 = smov 4  }
  0x16   :  { %100 = dma.hbm_to_vmem [thread:$0]  %s93_s2, 2048, %s95_s29, [#allocation12], %s1523_s1, %s1523_s1, %s1524_s5  }
  0x17   :  { %1503 = dma.done.wait [#allocation3], 256  }
  0x18   :  { %1504 = vsyncadd [#allocation3], 4294967040 }
  0x19   :  { %1505 = dma.done.wait [#allocation6], 288  }
  0x1a   :  { %1506 = vsyncadd [#allocation6], 4294967008 }
  0x1b   :  { %1507 = dma.done.wait [#allocation9], 8192  }
  0x1c   :  { %1508 = vsyncadd [#allocation9], 4294959104 }
  0x1d   :  { %1509 = dma.done.wait [#allocation12], 2048  }
  0x1e   :  { %1510 = vsyncadd [#allocation12], 4294965248  ;;  %v909_v0 = vld [vmem:[#allocation5] sm:$0xf]  ;;  %v1238_v1 = vld [vmem:[#allocation5 + $0x4] sm:$0xf0] }
  0x1f   :  { %v1237_v2 = vld [vmem:[#allocation5 + $0x4] sm:$0xf]  ;;  %v910_v3 = vor.u32 %v1238_v1, %v909_v0  ;;  %v911_v4 = vld [vmem:[#allocation5 + $0x8] sm:$0xf0]  ;;  %v132_v5 = vld [vmem:[#allocation2] sm:$0xff]  ;;  %vm153_vm0 = vcmask 130048  }
  0x20   :  { %v133_v6 = vld [vmem:[#allocation2 + $0x8] sm:$0xff]  ;;  %v914_v7 = vor.u32 %v1237_v2, %v911_v4  ;;  %v975_v9 = vld [vmem:[#allocation8 + $0x70] sm:$0xf]  ;;  %v1254_v10 = vld [vmem:[#allocation8 + $0x74] sm:$0xf0] }
  0x21   :  { %v134_v8 = vpack.c.bf16 %v133_v6, %v132_v5  ;;  %v1039_v11 = vld [vmem:[#allocation8 + $0xf0] sm:$0xf]  ;;  %164 = vmatpush.bf16.msra.mxu0 %v910_v3  ;;  %v976_v12 = vor.u32 %v1254_v10, %v975_v9  ;;  %v1270_v13 = vld [vmem:[#allocation8 + $0xf4] sm:$0xf0]  ;;  %v1253_v14 = vld [vmem:[#allocation8 + $0x74] sm:$0xf] }
  0x22   :  { %v977_v15 = vld [vmem:[#allocation8 + $0x78] sm:$0xf0]  ;;  %178 = vmatpush.bf16.msra.mxu1 %v914_v7  ;;  %v1040_v16 = vor.u32 %v1270_v13, %v1039_v11  ;;  %v1269_v18 = vld [vmem:[#allocation8 + $0xf4] sm:$0xf]  ;;  %v967_v20 = vld [vmem:[#allocation8 + $0x60] sm:$0xf] }
  0x23   :  { %v980_v17 = vor.u32 %v1253_v14, %v977_v15  ;;  %v1041_v19 = vld [vmem:[#allocation8 + $0xf8] sm:$0xf0]  ;;  %389 = vmatpush.bf16.msra.mxu2 %v976_v12  ;;  %v1252_v22 = vld [vmem:[#allocation8 + $0x64] sm:$0xf0]  ;;  %v1031_v23 = vld [vmem:[#allocation8 + $0xe0] sm:$0xf] }
  0x24   :  { %v1044_v21 = vor.u32 %v1269_v18, %v1041_v19  ;;  %v1268_v24 = vld [vmem:[#allocation8 + $0xe4] sm:$0xf0]  ;;  %915 = vmatmul.msk.bf16.vlgmr.msra.gmra.mxu0 %vm153_vm0, %v134_v8  ;;  %403 = vmatpush.bf16.msra.mxu3 %v1040_v16  ;;  %v968_v25 = vor.u32 %v1252_v22, %v967_v20  ;;  %v1251_v27 = vld [vmem:[#allocation8 + $0x64] sm:$0xf]  ;;  %v969_v28 = vld [vmem:[#allocation8 + $0x68] sm:$0xf0] }
  0x25   :  { %v1032_v26 = vor.u32 %v1268_v24, %v1031_v23  ;;  %v1267_v29 = vld [vmem:[#allocation8 + $0xe4] sm:$0xf]  ;;  %916 = vmatmul.msk.bf16.vlgmr.msra.gmra.mxu1 %vm153_vm0, %v134_v8  ;;  %417 = vmatpush.bf16.msrb.mxu0 %v980_v17  ;;  %v972_v30 = vor.u32 %v1251_v27, %v969_v28  ;;  %v1033_v31 = vld [vmem:[#allocation8 + $0xe8] sm:$0xf0]  ;;  %v959_v32 = vld [vmem:[#allocation8 + $0x50] sm:$0xf] }
  0x26   :  { %v1250_v33 = vld [vmem:[#allocation8 + $0x54] sm:$0xf0]  ;;  %431 = vmatpush.bf16.msrb.mxu1 %v1044_v21  ;;  %v1036_v34 = vor.u32 %v1267_v29, %v1033_v31  ;;  %v1023_v35 = vld [vmem:[#allocation8 + $0xd0] sm:$0xf]  ;;  %v1249_v37 = vld [vmem:[#allocation8 + $0x54] sm:$0xf] }
  0x27   :  { %v1266_v36 = vld [vmem:[#allocation8 + $0xd4] sm:$0xf0]  ;;  %390 = vmatpush.bf16.msra.mxu2 %v968_v25  ;;  %v960_v38 = vor.u32 %v1250_v33, %v959_v32  ;;  %v961_v39 = vld [vmem:[#allocation8 + $0x58] sm:$0xf0]  ;;  %v1265_v40 = vld [vmem:[#allocation8 + $0xd4] sm:$0xf] }
  0x28   :  { %v1025_v41 = vld [vmem:[#allocation8 + $0xd8] sm:$0xf0]  ;;  %404 = vmatpush.bf16.msra.mxu3 %v1032_v26  ;;  %v1024_v42 = vor.u32 %v1266_v36, %v1023_v35  ;;  %v951_v43 = vld [vmem:[#allocation8 + $0x40] sm:$0xf]  ;;  %v1248_v44 = vld [vmem:[#allocation8 + $0x44] sm:$0xf0]  ;;  %v964_v45 = vor.u32 %v1249_v37, %v961_v39 }
  0x29   :  { %418 = vmatpush.bf16.msrb.mxu0 %v972_v30  ;;  %v1015_v46 = vld [vmem:[#allocation8 + $0xc0] sm:$0xf]  ;;  %v1264_v47 = vld [vmem:[#allocation8 + $0xc4] sm:$0xf0]  ;;  %v1028_v48 = vor.u32 %v1265_v40, %v1025_v41  ;;  %v1247_v49 = vld [vmem:[#allocation8 + $0x44] sm:$0xf]  ;;  %v952_v52 = vor.u32 %v1248_v44, %v951_v43 }
  0x2a   :  { %432 = vmatpush.bf16.msrb.mxu1 %v1036_v34  ;;  %v953_v50 = vld [vmem:[#allocation8 + $0x48] sm:$0xf0]  ;;  %v1263_v51 = vld [vmem:[#allocation8 + $0xc4] sm:$0xf]  ;;  %v1016_v54 = vor.u32 %v1264_v47, %v1015_v46  ;;  %v943_v57 = vld [vmem:[#allocation8 + $0x30] sm:$0xf] }
  0x2b   :  { %391 = vmatpush.bf16.msra.mxu2 %v960_v38  ;;  %v1017_v53 = vld [vmem:[#allocation8 + $0xc8] sm:$0xf0]  ;;  %v956_v55 = vor.u32 %v1247_v49, %v953_v50  ;;  %v1246_v58 = vld [vmem:[#allocation8 + $0x34] sm:$0xf0]  ;;  %v1007_v59 = vld [vmem:[#allocation8 + $0xb0] sm:$0xf] }
  0x2c   :  { %405 = vmatpush.bf16.msra.mxu3 %v1024_v42  ;;  %v1020_v56 = vor.u32 %v1263_v51, %v1017_v53  ;;  %v944_v60 = vor.u32 %v1246_v58, %v943_v57  ;;  %v1262_v61 = vld [vmem:[#allocation8 + $0xb4] sm:$0xf0]  ;;  %v1245_v62 = vld [vmem:[#allocation8 + $0x34] sm:$0xf]  ;;  %v945_v63 = vld [vmem:[#allocation8 + $0x38] sm:$0xf0] }
  0x2d   :  { %419 = vmatpush.bf16.msrb.mxu0 %v964_v45  ;;  %v1008_v0 = vor.u32 %v1262_v61, %v1007_v59  ;;  %v948_v1 = vor.u32 %v1245_v62, %v945_v63  ;;  %v1261_v2 = vld [vmem:[#allocation8 + $0xb4] sm:$0xf]  ;;  %v1009_v3 = vld [vmem:[#allocation8 + $0xb8] sm:$0xf0]  ;;  %v935_v5 = vld [vmem:[#allocation8 + $0x20] sm:$0xf] }
  0x2e   :  { %433 = vmatpush.bf16.msrb.mxu1 %v1028_v48  ;;  %v1012_v4 = vor.u32 %v1261_v2, %v1009_v3  ;;  %v1244_v6 = vld [vmem:[#allocation8 + $0x24] sm:$0xf0]  ;;  %v999_v8 = vld [vmem:[#allocation8 + $0xa0] sm:$0xf]  ;;  %v1243_v10 = vld [vmem:[#allocation8 + $0x24] sm:$0xf] }
  0x2f   :  { %392 = vmatpush.bf16.msra.mxu2 %v952_v52  ;;  %v936_v7 = vor.u32 %v1244_v6, %v935_v5  ;;  %v1260_v9 = vld [vmem:[#allocation8 + $0xa4] sm:$0xf0]  ;;  %v937_v12 = vld [vmem:[#allocation8 + $0x28] sm:$0xf0]  ;;  %v1259_v13 = vld [vmem:[#allocation8 + $0xa4] sm:$0xf] }
  0x30   :  { %406 = vmatpush.bf16.msra.mxu3 %v1016_v54  ;;  %v1000_v11 = vor.u32 %v1260_v9, %v999_v8  ;;  %v1001_v14 = vld [vmem:[#allocation8 + $0xa8] sm:$0xf0]  ;;  %v940_v15 = vor.u32 %v1243_v10, %v937_v12  ;;  %v927_v17 = vld [vmem:[#allocation8 + $0x10] sm:$0xf]  ;;  %v1242_v18 = vld [vmem:[#allocation8 + $0x14] sm:$0xf0] }
  0x31   :  { %420 = vmatpush.bf16.msrb.mxu0 %v956_v55  ;;  %v1004_v16 = vor.u32 %v1259_v13, %v1001_v14  ;;  %v991_v19 = vld [vmem:[#allocation8 + $0x90] sm:$0xf]  ;;  %v928_v20 = vor.u32 %v1242_v18, %v927_v17  ;;  %v1258_v21 = vld [vmem:[#allocation8 + $0x94] sm:$0xf0]  ;;  %v1241_v22 = vld [vmem:[#allocation8 + $0x14] sm:$0xf] }
  0x32   :  { %434 = vmatpush.bf16.msrb.mxu1 %v1020_v56  ;;  %v929_v23 = vld [vmem:[#allocation8 + $0x18] sm:$0xf0]  ;;  %v992_v24 = vor.u32 %v1258_v21, %v991_v19  ;;  %v1257_v26 = vld [vmem:[#allocation8 + $0x94] sm:$0xf]  ;;  %v919_v29 = vld [vmem:[#allocation8] sm:$0xf] }
  0x33   :  { %393 = vmatpush.bf16.msra.mxu2 %v944_v60  ;;  %v932_v25 = vor.u32 %v1241_v22, %v929_v23  ;;  %v993_v27 = vld [vmem:[#allocation8 + $0x98] sm:$0xf0]  ;;  %v1240_v30 = vld [vmem:[#allocation8 + $0x4] sm:$0xf0]  ;;  %v983_v31 = vld [vmem:[#allocation8 + $0x80] sm:$0xf] }
  0x34   :  { %407 = vmatpush.bf16.msra.mxu3 %v1008_v0  ;;  %v996_v28 = vor.u32 %v1257_v26, %v993_v27  ;;  %v920_v32 = vor.u32 %v1240_v30, %v919_v29  ;;  %v1256_v33 = vld [vmem:[#allocation8 + $0x84] sm:$0xf0]  ;;  %v1239_v34 = vld [vmem:[#allocation8 + $0x4] sm:$0xf]  ;;  %v921_v35 = vld [vmem:[#allocation8 + $0x8] sm:$0xf0] }
  0x35   :  { %421 = vmatpush.bf16.msrb.mxu0 %v948_v1  ;;  %v984_v36 = vor.u32 %v1256_v33, %v983_v31  ;;  %v924_v37 = vor.u32 %v1239_v34, %v921_v35  ;;  %v1255_v38 = vld [vmem:[#allocation8 + $0x84] sm:$0xf]  ;;  %v985_v39 = vld [vmem:[#allocation8 + $0x88] sm:$0xf0]  ;;  %v1167_v41 = vld [vmem:[#allocation10 + $0xf0] sm:$0xf] }
  0x36   :  { %435 = vmatpush.bf16.msrb.mxu1 %v1012_v4  ;;  %v988_v40 = vor.u32 %v1255_v38, %v985_v39  ;;  %v1302_v42 = vld [vmem:[#allocation10 + $0xf4] sm:$0xf0]  ;;  %v1301_v43 = vld [vmem:[#allocation10 + $0xf4] sm:$0xf]  ;;  %v1169_v45 = vld [vmem:[#allocation10 + $0xf8] sm:$0xf0] }
  0x37   :  { %394 = vmatpush.bf16.msra.mxu2 %v936_v7  ;;  %v1168_v44 = vor.u32 %v1302_v42, %v1167_v41  ;;  %v1159_v46 = vld [vmem:[#allocation10 + $0xe0] sm:$0xf]  ;;  %v1300_v47 = vld [vmem:[#allocation10 + $0xe4] sm:$0xf0]  ;;  %v1172_v48 = vor.u32 %v1301_v43, %v1169_v45  ;;  %v1299_v49 = vld [vmem:[#allocation10 + $0xe4] sm:$0xf] }
  0x38   :  { %408 = vmatpush.bf16.msra.mxu3 %v1000_v11  ;;  %v1161_v50 = vld [vmem:[#allocation10 + $0xe8] sm:$0xf0]  ;;  %v1103_v51 = vld [vmem:[#allocation10 + $0x70] sm:$0xf]  ;;  %v1160_v52 = vor.u32 %v1300_v47, %v1159_v46  ;;  %v1286_v53 = vld [vmem:[#allocation10 + $0x74] sm:$0xf0] }
  0x39   :  { %422 = vmatpush.bf16.msrb.mxu0 %v940_v15  ;;  %v1285_v54 = vld [vmem:[#allocation10 + $0x74] sm:$0xf]  ;;  %v1105_v55 = vld [vmem:[#allocation10 + $0x78] sm:$0xf0]  ;;  %v1164_v56 = vor.u32 %v1299_v49, %v1161_v50  ;;  %v1104_v57 = vor.u32 %v1286_v53, %v1103_v51  ;;  %v1151_v59 = vld [vmem:[#allocation10 + $0xd0] sm:$0xf] }
  0x3a   :  { %436 = vmatpush.bf16.msrb.mxu1 %v1004_v16  ;;  %v1108_v58 = vor.u32 %v1285_v54, %v1105_v55  ;;  %v1298_v60 = vld [vmem:[#allocation10 + $0xd4] sm:$0xf0]  ;;  %v1297_v61 = vld [vmem:[#allocation10 + $0xd4] sm:$0xf]  ;;  %v1153_v62 = vld [vmem:[#allocation10 + $0xd8] sm:$0xf0] }
  0x3b   :  { %395 = vmatpush.bf16.msra.mxu2 %v928_v20  ;;  %v1095_v63 = vld [vmem:[#allocation10 + $0x60] sm:$0xf]  ;;  %v1284_v0 = vld [vmem:[#allocation10 + $0x64] sm:$0xf0]  ;;  %v1283_v2 = vld [vmem:[#allocation10 + $0x64] sm:$0xf]  ;;  %v1152_v4 = vor.u32 %v1298_v60, %v1151_v59  ;;  %v1156_v6 = vor.u32 %v1297_v61, %v1153_v62 }
  0x3c   :  { %409 = vmatpush.bf16.msra.mxu3 %v992_v24  ;;  %v1096_v1 = vor.u32 %v1284_v0, %v1095_v63  ;;  %v1097_v3 = vld [vmem:[#allocation10 + $0x68] sm:$0xf0]  ;;  %v1143_v7 = vld [vmem:[#allocation10 + $0xc0] sm:$0xf]  ;;  %v1296_v8 = vld [vmem:[#allocation10 + $0xc4] sm:$0xf0] }
  0x3d   :  { %423 = vmatpush.bf16.msrb.mxu0 %v932_v25  ;;  %v1100_v5 = vor.u32 %v1283_v2, %v1097_v3  ;;  %v1295_v9 = vld [vmem:[#allocation10 + $0xc4] sm:$0xf]  ;;  %v1145_v10 = vld [vmem:[#allocation10 + $0xc8] sm:$0xf0]  ;;  %v1144_v11 = vor.u32 %v1296_v8, %v1143_v7  ;;  %v137_v13 = vld [vmem:[#allocation7] sm:$0x3] }
  0x3e   :  { %437 = vmatpush.bf16.msrb.mxu1 %v996_v28  ;;  %v1148_v12 = vor.u32 %v1295_v9, %v1145_v10  ;;  %v139_v16 = vperm.slane %v137_v13, 0  ;;  %v140_v17 = vperm.slane %v137_v13, 1  ;;  %v1087_v30 = vld [vmem:[#allocation10 + $0x50] sm:$0xf]  ;;  %v1282_v31 = vld [vmem:[#allocation10 + $0x54] sm:$0xf0] }
  0x3f   :  { %396 = vmatpush.bf16.msra.mxu2 %v920_v32  ;;  %v1281_v32 = vld [vmem:[#allocation10 + $0x54] sm:$0xf]  ;;  %v1088_v33 = vor.u32 %v1282_v31, %v1087_v30  ;;  %v1089_v34 = vld [vmem:[#allocation10 + $0x58] sm:$0xf0]  ;;  %v1079_v42 = vld [vmem:[#allocation10 + $0x40] sm:$0xf] }
  0x40   :  { %410 = vmatpush.bf16.msra.mxu3 %v984_v36  ;;  %v1092_v35 = vor.u32 %v1281_v32, %v1089_v34  ;;  %v1135_v36 = vld [vmem:[#allocation10 + $0xb0] sm:$0xf]  ;;  %v1293_v38 = vld [vmem:[#allocation10 + $0xb4] sm:$0xf]  ;;  %v1280_v43 = vld [vmem:[#allocation10 + $0x44] sm:$0xf0] }
  0x41   :  { %424 = vmatpush.bf16.msrb.mxu0 %v924_v37  ;;  %v1294_v37 = vld [vmem:[#allocation10 + $0xb4] sm:$0xf0]  ;;  %v1080_v45 = vor.u32 %v1280_v43, %v1079_v42  ;;  %v1081_v46 = vld [vmem:[#allocation10 + $0x48] sm:$0xf0]  ;;  %v1292_v49 = vld [vmem:[#allocation10 + $0xa4] sm:$0xf0] }
  0x42   :  { %438 = vmatpush.bf16.msrb.mxu1 %v988_v40  ;;  %v1136_v39 = vor.u32 %v1294_v37, %v1135_v36  ;;  %v1137_v40 = vld [vmem:[#allocation10 + $0xb8] sm:$0xf0]  ;;  %v1291_v50 = vld [vmem:[#allocation10 + $0xa4] sm:$0xf]  ;;  %v1071_v54 = vld [vmem:[#allocation10 + $0x30] sm:$0xf] }
  0x43   :  { %649 = vmatpush.bf16.msrb.mxu2 %v1104_v57  ;;  %v1140_v41 = vor.u32 %v1293_v38, %v1137_v40  ;;  %v1278_v55 = vld [vmem:[#allocation10 + $0x34] sm:$0xf0]  ;;  %v1119_v60 = vld [vmem:[#allocation10 + $0x90] sm:$0xf]  ;;  %v1289_v62 = vld [vmem:[#allocation10 + $0x94] sm:$0xf] }
  0x44   :  { %663 = vmatpush.bf16.msrb.mxu3 %v1168_v44  ;;  %v1279_v44 = vld [vmem:[#allocation10 + $0x44] sm:$0xf]  ;;  %v1072_v57 = vor.u32 %v1278_v55, %v1071_v54  ;;  %v1290_v61 = vld [vmem:[#allocation10 + $0x94] sm:$0xf0]  ;;  %v1121_v0 = vld [vmem:[#allocation10 + $0x98] sm:$0xf0] }
  0x45   :  { %677 = vmatpush.bf16.msra.mxu0 %v1108_v58  ;;  %v1084_v47 = vor.u32 %v1279_v44, %v1081_v46  ;;  %v1073_v58 = vld [vmem:[#allocation10 + $0x38] sm:$0xf0]  ;;  %v1120_v63 = vor.u32 %v1290_v61, %v1119_v60  ;;  %v1063_v2 = vld [vmem:[#allocation10 + $0x20] sm:$0xf]  ;;  %v1276_v3 = vld [vmem:[#allocation10 + $0x24] sm:$0xf0] }
  0x46   :  { %691 = vmatpush.bf16.msra.mxu1 %v1172_v48  ;;  %v1127_v48 = vld [vmem:[#allocation10 + $0xa0] sm:$0xf]  ;;  %v1288_v9 = vld [vmem:[#allocation10 + $0x84] sm:$0xf0]  ;;  %v1287_v10 = vld [vmem:[#allocation10 + $0x84] sm:$0xf] }
  0x47   :  { %650 = vmatpush.bf16.msrb.mxu2 %v1096_v1  ;;  %v1128_v51 = vor.u32 %v1292_v49, %v1127_v48  ;;  %v1124_v1 = vor.u32 %v1289_v62, %v1121_v0  ;;  %v1111_v8 = vld [vmem:[#allocation10 + $0x80] sm:$0xf]  ;;  %v1316_v54 = vld [vmem:[#allocation11 + $0x68] sm:$0xff]  ;;  %v1309_v55 = vld [vmem:[#allocation11 + $0x30] sm:$0xff] }
  0x48   :  { %664 = vmatpush.bf16.msrb.mxu3 %v1160_v52  ;;  %v1129_v52 = vld [vmem:[#allocation10 + $0xa8] sm:$0xf0]  ;;  %v1313_v60 = vld [vmem:[#allocation11 + $0x50] sm:$0xff]  ;;  %v1306_v61 = vld [vmem:[#allocation11 + $0x18] sm:$0xff] }
  0x49   :  { %678 = vmatpush.bf16.msra.mxu0 %v1100_v5  ;;  %v1132_v53 = vor.u32 %v1291_v50, %v1129_v52  ;;  %v1064_v5 = vor.u32 %v1276_v3, %v1063_v2  ;;  %v1312_v62 = vld [vmem:[#allocation11 + $0x48] sm:$0xff]  ;;  %v1311_v0 = vld [vmem:[#allocation11 + $0x40] sm:$0xff]  ;;  %v483_v3 = vld [vmem:[%s1645_s6] sm:$0x3] }
  0x4a   :  { %692 = vmatpush.bf16.msra.mxu1 %v1164_v56  ;;  %v1277_v56 = vld [vmem:[#allocation10 + $0x34] sm:$0xf]  ;;  %v1303_v2 = vld [vmem:[#allocation11] sm:$0xff] }
  0x4b   :  { %651 = vmatpush.bf16.msrb.mxu2 %v1088_v33  ;;  %v1076_v59 = vor.u32 %v1277_v56, %v1073_v58  ;;  %v1315_v56 = vld [vmem:[#allocation11 + $0x60] sm:$0xff]  ;;  %v1314_v58 = vld [vmem:[#allocation11 + $0x58] sm:$0xff] }
  0x4c   :  { %665 = vmatpush.bf16.msrb.mxu3 %v1152_v4  ;;  %v1275_v4 = vld [vmem:[#allocation10 + $0x24] sm:$0xf] }
  0x4d   :  { %679 = vmatpush.bf16.msra.mxu0 %v1092_v35 }
  0x4e   :  { %693 = vmatpush.bf16.msra.mxu1 %v1156_v6  ;;  %v1065_v6 = vld [vmem:[#allocation10 + $0x28] sm:$0xf0] }
  0x4f   :  { %652 = vmatpush.bf16.msrb.mxu2 %v1080_v45  ;;  %v1068_v7 = vor.u32 %v1275_v4, %v1065_v6  ;;  %v486_v6 = vperm.slane %v483_v3, 1 }
  0x50   :  { %666 = vmatpush.bf16.msrb.mxu3 %v1144_v11  ;;  %v1112_v11 = vor.u32 %v1288_v9, %v1111_v8 }
  0x51   :  { %680 = vmatpush.bf16.msra.mxu0 %v1084_v47 }
  0x52   :  { %694 = vmatpush.bf16.msra.mxu1 %v1148_v12  ;;  %v1113_v12 = vld [vmem:[#allocation10 + $0x88] sm:$0xf0] }
  0x53   :  { %653 = vmatpush.bf16.msrb.mxu2 %v1072_v57  ;;  %v1116_v13 = vor.u32 %v1287_v10, %v1113_v12  ;;  %v1308_v57 = vld [vmem:[#allocation11 + $0x28] sm:$0xff]  ;;  %v485_v10 = vperm.slane %v483_v3, 0 }
  0x54   :  { %667 = vmatpush.bf16.msrb.mxu3 %v1136_v39 }
  0x55   :  { %681 = vmatpush.bf16.msra.mxu0 %v1076_v59  ;;  %v1307_v59 = vld [vmem:[#allocation11 + $0x20] sm:$0xff] }
  0x56   :  { %695 = vmatpush.bf16.msra.mxu1 %v1140_v41 }
  0x57   :  { %654 = vmatpush.bf16.msrb.mxu2 %v1064_v5 }
  0x58   :  { %668 = vmatpush.bf16.msrb.mxu3 %v1128_v51 }
  0x59   :  { %682 = vmatpush.bf16.msra.mxu0 %v1068_v7 }
  0x5a   :  { %696 = vmatpush.bf16.msra.mxu1 %v1132_v53 }
  0x5c   :  { %669 = vmatpush.bf16.msrb.mxu3 %v1120_v63  ;;  %v1305_v63 = vld [vmem:[#allocation11 + $0x10] sm:$0xff] }
  0x5e   :  { %697 = vmatpush.bf16.msra.mxu1 %v1124_v1  ;;  %v1304_v1 = vld [vmem:[#allocation11 + $0x8] sm:$0xff] }
  0x60   :  { %670 = vmatpush.bf16.msrb.mxu3 %v1112_v11 }
  0x62   :  { %698 = vmatpush.bf16.msra.mxu1 %v1116_v13 }
  0xa1   :  { %v166_v14 = vpop.f32.mrf.mxu0 }
  0xa2   :  { %v180_v15 = vpop.f32.mrf.mxu1  ;;  %v167_v18 = vadd.f32 %v166_v14, %v139_v16  ;;  %v1055_v14 = vld [vmem:[#allocation10 + $0x10] sm:$0xf] }
  0xa3   :  { %v181_v19 = vadd.f32 %v180_v15, %v140_v17  ;;  %v1274_v15 = vld [vmem:[#allocation10 + $0x14] sm:$0xf0] }
  0xa4   :  { %v185_v24 = vmax.f32 %v167_v18, 0.0  ;;  %v1057_v18 = vld [vmem:[#allocation10 + $0x18] sm:$0xf0] }
  0xa5   :  { %v186_v26 = vmax.f32 %v181_v19, 0.0 }
  0xa9   :  { %v168_v20 = vpop.f32.mrf.mxu0 }
  0xaa   :  { %v169_v21 = vadd.f32 %v168_v20, %v139_v16  ;;  %v182_v22 = vpop.f32.mrf.mxu1  ;;  %v1273_v16 = vld [vmem:[#allocation10 + $0x14] sm:$0xf]  ;;  %v1047_v20 = vld [vmem:[#allocation10] sm:$0xf] }
  0xab   :  { %v183_v23 = vadd.f32 %v182_v22, %v140_v17  ;;  %v1056_v17 = vor.u32 %v1274_v15, %v1055_v14  ;;  %v1060_v19 = vor.u32 %v1273_v16, %v1057_v18  ;;  %v1271_v22 = vld [vmem:[#allocation10 + $0x4] sm:$0xf] }
  0xac   :  { %v187_v25 = vmax.f32 %v169_v21, 0.0  ;;  %v1272_v21 = vld [vmem:[#allocation10 + $0x4] sm:$0xf0] }
  0xad   :  { %v188_v27 = vmax.f32 %v183_v23, 0.0  ;;  %655 = vmatpush.bf16.msrb.mxu2 %v1056_v17  ;;  %683 = vmatpush.bf16.msra.mxu0 %v1060_v19  ;;  %v1048_v23 = vor.u32 %v1272_v21, %v1047_v20 }
  0xae   :  { %v189_v28 = vpack.c.bf16 %v187_v25, %v185_v24  ;;  %v1049_v24 = vld [vmem:[#allocation10 + $0x8] sm:$0xf0] }
  0xaf   :  { %v190_v29 = vpack.c.bf16 %v188_v27, %v186_v26  ;;  %v1052_v25 = vor.u32 %v1271_v22, %v1049_v24  ;;  %v1318_v26 = vld [vmem:[#allocation11 + $0x78] sm:$0xff] }
  0xb0   :  { %397 = vmatmul.bf16.vlgmr.msra.gmra.mxu2 %v189_v28  ;;  %425 = vmatmul.bf16.vlgmr.msrb.gmra.mxu0 %v189_v28  ;;  %v1310_v27 = vld [vmem:[#allocation11 + $0x38] sm:$0xff]  ;;  %v1317_v28 = vld [vmem:[#allocation11 + $0x70] sm:$0xff] }
  0xb1   :  { %411 = vmatmul.bf16.vlgmr.msra.gmra.mxu3 %v190_v29  ;;  %439 = vmatmul.bf16.vlgmr.msrb.gmra.mxu1 %v190_v29  ;;  %v223_v29 = vld [vmem:[%s1643_s4] sm:$0x3] }
  0xb2   :  { %656 = vmatpush.bf16.msrb.mxu2 %v1048_v23  ;;  %684 = vmatpush.bf16.msra.mxu0 %v1052_v25  ;;  %v226_v31 = vperm.slane %v223_v29, 1  ;;  %v225_v35 = vperm.slane %v223_v29, 0 }
  0xb3   :  { %857 = vmatpush.bf16.msra.mxu3 %v1318_v26 }
  0xb6   :  { %843 = vmatpush.bf16.msra.mxu2 %v1310_v27 }
  0xb7   :  { %858 = vmatpush.bf16.msra.mxu3 %v1317_v28  ;;  %v1332_v28 = vld [vmem:[%s1647_s8] ss:$0 sm:$0xff] }
  0xba   :  { %844 = vmatpush.bf16.msra.mxu2 %v1309_v55 }
  0xbb   :  { %859 = vmatpush.bf16.msra.mxu3 %v1316_v54 }
  0xbe   :  { %845 = vmatpush.bf16.msra.mxu2 %v1308_v57 }
  0xbf   :  { %860 = vmatpush.bf16.msra.mxu3 %v1315_v56 }
  0xc2   :  { %846 = vmatpush.bf16.msra.mxu2 %v1307_v59 }
  0xc3   :  { %861 = vmatpush.bf16.msra.mxu3 %v1314_v58 }
  0xc6   :  { %847 = vmatpush.bf16.msra.mxu2 %v1306_v61 }
  0xc7   :  { %862 = vmatpush.bf16.msra.mxu3 %v1313_v60 }
  0xca   :  { %848 = vmatpush.bf16.msra.mxu2 %v1305_v63 }
  0xcb   :  { %863 = vmatpush.bf16.msra.mxu3 %v1312_v62 }
  0xce   :  { %849 = vmatpush.bf16.msra.mxu2 %v1304_v1 }
  0xcf   :  { %864 = vmatpush.bf16.msra.mxu3 %v1311_v0 }
  0xd2   :  { %850 = vmatpush.bf16.msra.mxu2 %v1303_v2 }
 0x12d   :  { %v426_v30 = vpop.f32.mrf.mxu0 }
 0x12e   :  { %v440_v32 = vpop.f32.mrf.mxu1  ;;  %v427_v33 = vadd.f32 %v426_v30, %v226_v31 }
 0x130   :  { %v441_v38 = vadd.f32 %v440_v32, %v427_v33  ;;  %v1333_v32 = vld [vmem:[%s1648_s9] ss:$0 sm:$0xff] }
 0x132   :  { %v446_v43 = vmax.f32 %v441_v38, 0.0 }
 0x133   :  { %v398_v34 = vpop.f32.mrf.mxu2 }
 0x134   :  { %v412_v36 = vpop.f32.mrf.mxu3  ;;  %v399_v41 = vadd.f32 %v398_v34, %v225_v35  ;;  %v1334_v34 = vld [vmem:[%s1649_s10] ss:$0 sm:$0xff] }
 0x135   :  { %v428_v37 = vpop.f32.mrf.mxu0 }
 0x136   :  { %v429_v39 = vadd.f32 %v428_v37, %v226_v31  ;;  %v442_v40 = vpop.f32.mrf.mxu1  ;;  %v413_v46 = vadd.f32 %v412_v36, %v399_v41 }
 0x138   :  { %v443_v42 = vadd.f32 %v442_v40, %v429_v39  ;;  %v445_v51 = vmax.f32 %v413_v46, 0.0 }
 0x13a   :  { %v448_v44 = vmax.f32 %v443_v42, 0.0 }
 0x13b   :  { %v400_v45 = vpop.f32.mrf.mxu2 }
 0x13c   :  { %v450_v47 = vpack.c.bf16 %v448_v44, %v446_v43  ;;  %v401_v48 = vadd.f32 %v400_v45, %v225_v35  ;;  %v414_v49 = vpop.f32.mrf.mxu3 }
 0x13e   :  { %v415_v50 = vadd.f32 %v414_v49, %v401_v48  ;;  %671 = vmatmul.bf16.vlgmr.msrb.gmra.mxu3 %v450_v47  ;;  %699 = vmatmul.bf16.vlgmr.msra.gmra.mxu1 %v450_v47 }
 0x140   :  { %v447_v52 = vmax.f32 %v415_v50, 0.0 }
 0x142   :  { %v449_v53 = vpack.c.bf16 %v447_v52, %v445_v51 }
 0x144   :  { %657 = vmatmul.bf16.vlgmr.msrb.gmra.mxu2 %v449_v53  ;;  %685 = vmatmul.bf16.vlgmr.msra.gmra.mxu0 %v449_v53 }
 0x1bb   :  { %v700_v4 = vpop.f32.mrf.mxu1 }
 0x1c1   :  { %v686_v5 = vpop.f32.mrf.mxu0  ;;  %v672_v8 = vpop.f32.mrf.mxu3 }
 0x1c2   :  { %v687_v7 = vadd.f32 %v686_v5, %v486_v6 }
 0x1c3   :  { %v702_v14 = vpop.f32.mrf.mxu1 }
 0x1c4   :  { %v701_v12 = vadd.f32 %v700_v4, %v687_v7 }
 0x1c6   :  { %v706_v17 = vmax.f32 %v701_v12, 0.0 }
 0x1c7   :  { %v658_v9 = vpop.f32.mrf.mxu2 }
 0x1c8   :  { %v659_v15 = vadd.f32 %v658_v9, %v485_v10 }
 0x1c9   :  { %v688_v11 = vpop.f32.mrf.mxu0  ;;  %v674_v23 = vpop.f32.mrf.mxu3 }
 0x1ca   :  { %v689_v13 = vadd.f32 %v688_v11, %v486_v6  ;;  %v673_v20 = vadd.f32 %v672_v8, %v659_v15 }
 0x1cc   :  { %v703_v16 = vadd.f32 %v702_v14, %v689_v13  ;;  %v705_v25 = vmax.f32 %v673_v20, 0.0 }
 0x1ce   :  { %v708_v18 = vmax.f32 %v703_v16, 0.0 }
 0x1cf   :  { %v660_v19 = vpop.f32.mrf.mxu2 }
 0x1d0   :  { %v710_v21 = vpack.c.bf16 %v708_v18, %v706_v17  ;;  %v661_v22 = vadd.f32 %v660_v19, %v485_v10 }
 0x1d2   :  { %v675_v24 = vadd.f32 %v674_v23, %v661_v22  ;;  %865 = vmatmul.bf16.vlgmr.msra.gmra.mxu3 %v710_v21 }
 0x1d4   :  { %v707_v26 = vmax.f32 %v675_v24, 0.0 }
 0x1d6   :  { %v709_v27 = vpack.c.bf16 %v707_v26, %v705_v25 }
 0x1d8   :  { %851 = vmatmul.bf16.vlgmr.msra.gmra.mxu2 %v709_v27 }
 0x255   :  { %v866_v29 = vpop.f32.mrf.mxu3 }
 0x25b   :  { %v852_v30 = vpop.f32.mrf.mxu2 }
 0x25c   :  { %v853_v31 = vadd.f32 %v1332_v28, %v852_v30 }
 0x25d   :  { %v868_v39 = vpop.f32.mrf.mxu3 }
 0x25e   :  { %v867_v33 = vadd.f32 %v866_v29, %v853_v31 }
 0x260   :  { %v875_v35 = vmax.f32 %v867_v33, %v1333_v32 }
 0x262   :  { %v881_v36 = vmin.f32 %v875_v35, %v1334_v34 }
 0x263   :  { %v854_v37 = vpop.f32.mrf.mxu2 }
 0x264   :  { %883 = vst [vmem:[#allocation13] sm:$0xff] %v881_v36  ;;  %v855_v38 = vadd.f32 %v1332_v28, %v854_v37 }
 0x266   :  { %v869_v40 = vadd.f32 %v868_v39, %v855_v38 }
 0x268   :  { %v876_v41 = vmax.f32 %v869_v40, %v1333_v32 }
 0x26a   :  { %v882_v42 = vmin.f32 %v876_v41, %v1334_v34 }
 0x26c   :  { %884 = vst [vmem:[#allocation13 + $0x8] sm:$0xff] %v882_v42 }
 0x26d   :  { %888 = vsyncadd [#allocation4], 224  ;;  %s891_s9 = sshll.u32 %s1650_s11, 4  ;;  %s1525_s0 = smov [#allocation13]   ;;  %s892_s9 = int_to_ptr.hbm [resolvable:$true] %s891_s9 }
 0x26e   :  { %s889_s18 = sshll.u32 %s1525_s0, 4  ;;  %s890_s18 = int_to_ptr.vmem [resolvable:$true] %s889_s18 }
 0x26f   :  { %897 = dma.vmem_to_hbm [thread:$0]  %s890_s18, 32, %s892_s9, [#allocation4], %s1518_s16, %s1518_s16, %s1519_s17  }
 0x270   :  { %1511 = dma.done.wait [#allocation4], 256  }
 0x271   :  { %1512 = vsyncadd [#allocation4], 4294967040 }
 0x272   :  { %902 = vsyncpa [#allocation3], 1 }
 0x273   :  { %903 = vsyncpa [#allocation6], 1 }
 0x274   :  { %904 = vsyncpa [#allocation9], 1 }
 0x275   :  { %905 = vsyncpa [#allocation12], 1 }
 0x276   :  { %906 = vsyncpa [#allocation4], 1 }

</bundles_post_ra>
